<compile_context>
chip_gen: v5e
topology: v5e:2x2
jax: 0.10.0
libtpu: 0.0.40
codegen_flags: <defaults>
</compile_context>

<pallas_src>
import functools
import math

import jax
import jax.numpy as jnp
from jax.experimental import pallas as pl
from jax.experimental.pallas import tpu as pltpu


def _gelu_tanh(x):
    # torch.nn.GELU(approximate='tanh'):  0.5*x*(1+tanh(c*(x+0.044715*x^3)))
    # == x * sigmoid(2*c*(x+0.044715*x^3)); exp stays on the EUP slot.
    c = math.sqrt(2.0 / math.pi)
    z = (2.0 * c) * (x + 0.044715 * (x * x * x))
    return x / (1.0 + jnp.exp(-z))


# ----------------------------------------------------------------------------- kernels
def _mlp_kernel_resident(x_ref, w1_ref, b1_ref, w2_ref, b2_ref, o_ref):
    # Whole hidden dim resident: one fused step per row tile, no accumulator traffic.
    h = jnp.dot(x_ref[...], w1_ref[...], preferred_element_type=jnp.float32)
    h = _gelu_tanh(h + b1_ref[...])
    out = jnp.dot(h.astype(w2_ref.dtype), w2_ref[...],
                  preferred_element_type=jnp.float32)
    o_ref[...] = (out + b2_ref[...]).astype(o_ref.dtype)


def _mlp_kernel_stream(x_ref, w1_ref, b1_ref, w2_ref, b2_ref, o_ref, acc_ref):
    # Hidden dim streamed in slices along grid axis 1; f32 accumulator in VMEM.
    k = pl.program_id(1)

    h = jnp.dot(x_ref[...], w1_ref[...], preferred_element_type=jnp.float32)
    # GELU is elementwise over hidden features, so per-slice activation is exact.
    h = _gelu_tanh(h + b1_ref[...])
    partial = jnp.dot(h.astype(w2_ref.dtype), w2_ref[...],
                      preferred_element_type=jnp.float32)

    @pl.when(k == 0)
    def _():
        acc_ref[...] = partial          # first step writes; no zero-init + RMW

    @pl.when(k > 0)
    def _():
        acc_ref[...] += partial

    @pl.when(k == pl.num_programs(1) - 1)
    def _():
        o_ref[...] = (acc_ref[...] + b2_ref[...]).astype(o_ref.dtype)


# ----------------------------------------------------------------------------- helpers
def _round_up(x, m):
    return (x + m - 1) // m * m


def _cdiv(a, b):
    return -(-a // b)


def _tpu_generation_defaults():
    kind = ""
    try:
        kind = jax.devices()[0].device_kind.lower()
    except Exception:
        pass
    mib = 1024 * 1024
    if "v7" in kind:
        # 64 MiB physical VMEM, 2 TensorCores/chip.
        return dict(block_rows=512, block_hidden=1024, vmem_budget=56 * mib,
                    weight_buffers=2, two_tc=True)
    if "v6" in kind:
        # 128 MiB VMEM, ~1.4 TB/s HBM -> bigger row tiles, allow weight residency.
        return dict(block_rows=768, block_hidden=1024, vmem_budget=100 * mib,
                    weight_buffers=2, two_tc=False)
    if ("v5e" in kind) or ("v5 lite" in kind) or ("v5lite" in kind):
        # 128 MiB VMEM, slow HBM -> deeper buffering on streamed weight slices.
        return dict(block_rows=256, block_hidden=1024, vmem_budget=100 * mib,
                    weight_buffers=3, two_tc=False)
    # Unknown generation (v4/v5p/interpret): conservative settings.
    return dict(block_rows=512, block_hidden=1024, vmem_budget=48 * mib,
                weight_buffers=2, two_tc=False)


def _stream_vmem_bytes(tb, th, d_in, d_out_pad, x_item, w_item, nbuf):
    return (2 * tb * d_in * x_item                 # x row tile (double-buffered)
            + nbuf * d_in * th * w_item            # w1 hidden slice
            + nbuf * th * d_out_pad * w_item       # w2 hidden slice
            + 2 * (th + d_out_pad) * w_item        # biases
            + 2 * tb * d_out_pad * x_item          # out tile
            + tb * d_out_pad * 4                   # f32 accumulator scratch
            + tb * th * 4 + tb * d_out_pad * 4)    # GELU / partial temporaries


def _resident_vmem_bytes(tb, d_in, d_hid_pad, d_out_pad, x_item, w_item):
    return (2 * tb * d_in * x_item
            + 2 * d_in * d_hid_pad * w_item        # w1 (Pallas still double-buffers)
            + 2 * d_hid_pad * d_out_pad * w_item   # w2
            + 2 * (d_hid_pad + d_out_pad) * w_item
            + 2 * tb * d_out_pad * x_item
            + tb * d_hid_pad * 4                   # f32 GELU intermediate
            + tb * d_out_pad * 4)


# ----------------------------------------------------------------------------- wrapper
@functools.partial(
    jax.jit,
    static_argnames=("tb", "th", "n_pad", "d_hid_pad", "d_out_pad",
                     "weight_buffers", "vmem_limit", "resident"))
def _mlp_pallas_call(x, w1, b1, w2, b2, *, tb, th, n_pad, d_hid_pad, d_out_pad,
                     weight_buffers, vmem_limit, resident):
    n, d_in = x.shape
    d_hid = w1.shape[1]
    d_out = w2.shape[1]

    # Zero-pad to tile/lane-friendly shapes (zeros contribute nothing; padded
    # rows/columns are sliced off at the end).
    x_p = jnp.pad(x, ((0, n_pad - n), (0, 0)))
    w1_p = jnp.pad(w1, ((0, 0), (0, d_hid_pad - d_hid)))
    b1_p = jnp.pad(b1, (0, d_hid_pad - d_hid)).reshape(1, d_hid_pad)
    w2_p = jnp.pad(w2, ((0, d_hid_pad - d_hid), (0, d_out_pad - d_out)))
    b2_p = jnp.pad(b2, (0, d_out_pad - d_out)).reshape(1, d_out_pad)

    num_row_tiles = n_pad // tb
    num_k = d_hid_pad // th

    itemsize = lambda a: a.size * a.dtype.itemsize
    weight_bytes = itemsize(w1_p) + itemsize(w2_p)
    weight_reads = 1 if resident else num_row_tiles
    cost = pl.CostEstimate(
        flops=2 * n_pad * d_in * d_hid_pad + 2 * n_pad * d_hid_pad * d_out_pad,
        transcendentals=n_pad * d_hid_pad,
        bytes_accessed=(itemsize(x_p) + weight_reads * weight_bytes
                        + itemsize(b1_p) + itemsize(b2_p)
                        + n_pad * d_out_pad * x.dtype.itemsize),
    )

    if resident:
        grid_spec = pltpu.PrefetchScalarGridSpec(
            num_scalar_prefetch=0,
            grid=(num_row_tiles,),
            in_specs=[
                pl.BlockSpec((tb, d_in), lambda i: (i, 0)),          # x row tile
                pl.BlockSpec((d_in, d_hid_pad), lambda i: (0, 0)),   # w1 (resident)
                pl.BlockSpec((1, d_hid_pad), lambda i: (0, 0)),      # b1 (resident)
                pl.BlockSpec((d_hid_pad, d_out_pad), lambda i: (0, 0)),  # w2 (resident)
                pl.BlockSpec((1, d_out_pad), lambda i: (0, 0)),      # b2 (resident)
            ],
            out_specs=pl.BlockSpec((tb, d_out_pad), lambda i: (i, 0)),
        )
        kernel = _mlp_kernel_resident
        dim_sem = ("parallel",)
    else:
        def _wspec(shape, index_map):
            if weight_buffers != 2:
                # v5e: deeper buffering to hide the long per-step weight DMA.
                return pl.BlockSpec(shape, index_map,
                                    pipeline_mode=pl.Buffered(weight_buffers))
            return pl.BlockSpec(shape, index_map)

        grid_spec = pltpu.PrefetchScalarGridSpec(
            num_scalar_prefetch=0,
            grid=(num_row_tiles, num_k),
            in_specs=[
                pl.BlockSpec((tb, d_in), lambda i, k: (i, 0)),        # x row tile
                _wspec((d_in, th), lambda i, k: (0, k)),              # w1 hidden slice
                pl.BlockSpec((1, th), lambda i, k: (0, k)),           # b1 hidden slice
                _wspec((th, d_out_pad), lambda i, k: (k, 0)),         # w2 hidden slice
                pl.BlockSpec((1, d_out_pad), lambda i, k: (0, 0)),    # b2 (resident)
            ],
            out_specs=pl.BlockSpec((tb, d_out_pad), lambda i, k: (i, 0)),
            scratch_shapes=[pltpu.VMEM((tb, d_out_pad), jnp.float32)],
        )
        kernel = _mlp_kernel_stream
        dim_sem = ("parallel", "arbitrary")

    out = pl.pallas_call(
        kernel,
        out_shape=jax.ShapeDtypeStruct((n_pad, d_out_pad), x.dtype),
        grid_spec=grid_spec,
        compiler_params=pltpu.CompilerParams(
            dimension_semantics=dim_sem,
            vmem_limit_bytes=vmem_limit,
        ),
        cost_estimate=cost,
    )(x_p, w1_p, b1_p, w2_p, b2_p)

    return out[:n, :d_out]


def mlp_forward(x, w1, b1, w2, b2, *, block_rows=None, block_hidden=None):
    """x: (N, D_in); w1: (D_in, D_hid); b1: (D_hid,); w2: (D_hid, D_out); b2: (D_out,)."""
    n, d_in = x.shape
    d_hid, d_out = w2.shape
    assert w1.shape == (d_in, d_hid)
    assert b1.shape == (d_hid,)
    assert b2.shape == (d_out,)

    cfg = _tpu_generation_defaults()
    user_block_hidden = block_hidden
    block_rows = block_rows or cfg["block_rows"]
    block_hidden = block_hidden or cfg["block_hidden"]
    vmem_budget = cfg["vmem_budget"]
    weight_buffers = cfg["weight_buffers"]
    two_tc = cfg["two_tc"]

    x_item = x.dtype.itemsize
    w_item = w1.dtype.itemsize
    row_align = 16 if x.dtype == jnp.bfloat16 else 8

    d_out_pad = _round_up(d_out, 128)
    d_hid_full = _round_up(d_hid, 128)

    # Padding-aware row tile: minimize wasted rows for unlucky n.
    num_tiles = max(1, _cdiv(n, block_rows))
    tb = _round_up(_cdiv(n, num_tiles), row_align)
    tb = min(tb, _round_up(n, row_align))
    # Dual-TensorCore parts: make sure the 'parallel' row axis has >= 2 blocks.
    if two_tc and _round_up(n, tb) // tb < 2 and n > row_align:
        tb = _round_up(_cdiv(n, 2), row_align)
    n_pad = _round_up(n, tb)

    # Full weight residency (128 MiB-VMEM generations / small models) vs hidden streaming.
    force_stream = (user_block_hidden is not None) and (user_block_hidden < d_hid_full)
    resident = ((not force_stream) and
                _resident_vmem_bytes(tb, d_in, d_hid_full, d_out_pad,
                                     x_item, w_item) <= vmem_budget)

    if resident:
        th = d_hid_pad = d_hid_full
    else:
        th = min(_round_up(block_hidden, 128), d_hid_full)
        # Shrink hidden slice, then row tile, until the streaming working set fits VMEM.
        while _stream_vmem_bytes(tb, th, d_in, d_out_pad, x_item, w_item,
                                 weight_buffers) > vmem_budget:
            if th > 128:
                th = max(128, (th // 2) // 128 * 128)
            elif tb > row_align:
                tb = max(row_align, _round_up(tb // 2, row_align))
            else:
                break
        d_hid_pad = _round_up(d_hid, th)
        n_pad = _round_up(n, tb)

    return _mlp_pallas_call(
        x, w1, b1, w2, b2,
        tb=tb, th=th, n_pad=n_pad, d_hid_pad=d_hid_pad, d_out_pad=d_out_pad,
        weight_buffers=weight_buffers, vmem_limit=vmem_budget, resident=resident)


# ----------------------------------------------------------------------------- params / ref
def init_params(key, in_features, hidden_features=None, out_features=None,
                dtype=jnp.float32):
    out_features = out_features or in_features
    hidden_features = hidden_features or in_features * 4
    k1, k2, k3, k4 = jax.random.split(key, 4)
    # kaiming_normal_(mode='fan_in', nonlinearity='relu'): std = sqrt(2 / fan_in)
    w1 = jax.random.normal(k1, (in_features, hidden_features), dtype) * math.sqrt(
        2.0 / in_features)
    w2 = jax.random.normal(k2, (hidden_features, out_features), dtype) * math.sqrt(
        2.0 / hidden_features)
    # nn.Linear default bias init: U(-1/sqrt(fan_in), 1/sqrt(fan_in))
    b1 = jax.random.uniform(k3, (hidden_features,), dtype,
                            -1.0 / math.sqrt(in_features),
                            1.0 / math.sqrt(in_features))
    b2 = jax.random.uniform(k4, (out_features,), dtype,
                            -1.0 / math.sqrt(hidden_features),
                            1.0 / math.sqrt(hidden_features))
    return w1, b1, w2, b2


def mlp_reference(x, w1, b1, w2, b2):
    c = math.sqrt(2.0 / math.pi)
    h = x @ w1 + b1
    h = 0.5 * h * (1.0 + jnp.tanh(c * (h + 0.044715 * h ** 3)))   # torch tanh-GELU
    return h @ w2 + b2


if __name__ == "__main__":
    key = jax.random.PRNGKey(0)
    kx, kp, kx2, kp2 = jax.random.split(key, 4)

    # --- Test 1: f32, tiny shapes -> full weight-residency path (fused single step). ---
    in_f, hid_f, out_f, n = 32, 128, 32, 16
    x = jax.random.normal(kx, (n, in_f), jnp.float32)
    w1, b1, w2, b2 = init_params(kp, in_f, hid_f, out_f, jnp.float32)
    out = jax.block_until_ready(mlp_forward(x, w1, b1, w2, b2))
    ref = mlp_reference(x, w1, b1, w2, b2)
    assert out.shape == (n, out_f)
    assert jnp.allclose(out, ref, atol=1e-4, rtol=1e-4), "f32 mismatch vs reference"

    # --- Test 2: bf16, ragged rows, non-128-multiple hidden dim, forced hidden
    #     streaming (3 reduction steps) and multiple row tiles. ---
    in_f2, hid_f2, out_f2, n2 = 32, 320, 64, 20
    x2 = jax.random.normal(kx2, (n2, in_f2), jnp.float32).astype(jnp.bfloat16)
    p2 = init_params(kp2, in_f2, hid_f2, out_f2, jnp.float32)
    w1b, b1b, w2b, b2b = (p.astype(jnp.bfloat16) for p in p2)
    out2 = jax.block_until_ready(
        mlp_forward(x2, w1b, b1b, w2b, b2b, block_rows=16, block_hidden=128))
    ref2 = mlp_reference(*(a.astype(jnp.float32) for a in (x2, w1b, b1b, w2b, b2b)))
    assert out2.shape == (n2, out_f2)
    assert jnp.allclose(out2.astype(jnp.float32), ref2, atol=0.15, rtol=0.15), \
        "bf16 mismatch vs reference"

    print("KERNEL_OK")
</pallas_src>

<mosaic_0001>
module attributes {stable_mosaic.version = 11 : i64} {
  func.func @_mlp_kernel_resident(%arg0: i32, %arg1: memref<16x32xf32, #tpu.memory_space<vmem>>, %arg2: memref<32x128xf32, #tpu.memory_space<vmem>>, %arg3: memref<1x128xf32, #tpu.memory_space<vmem>>, %arg4: memref<128x128xf32, #tpu.memory_space<vmem>>, %arg5: memref<1x128xf32, #tpu.memory_space<vmem>>, %arg6: memref<16x128xf32, #tpu.memory_space<vmem>>) attributes {dimension_semantics = [#tpu.dimension_semantics<parallel>], iteration_bounds = array<i64: 1>, scalar_prefetch = 0 : i64, scratch_operands = 0 : i64, tpu.core_type = #tpu.core_type<tc>, window_params = [{transform_indices = @transform_0, window_bounds = array<i64: 16, 32>}, {pipeline_mode = #tpu.pipeline_mode<synchronous>, transform_indices = @transform_1, window_bounds = array<i64: 32, 128>}, {pipeline_mode = #tpu.pipeline_mode<synchronous>, transform_indices = @transform_2, window_bounds = array<i64: 1, 128>}, {pipeline_mode = #tpu.pipeline_mode<synchronous>, transform_indices = @transform_3, window_bounds = array<i64: 128, 128>}, {pipeline_mode = #tpu.pipeline_mode<synchronous>, transform_indices = @transform_4, window_bounds = array<i64: 1, 128>}, {transform_indices = @transform_5, window_bounds = array<i64: 16, 128>}]} {
    %c0 = arith.constant 0 : index
    %c0_0 = arith.constant 0 : index
    %0 = vector.load %arg1[%c0, %c0_0] : memref<16x32xf32, #tpu.memory_space<vmem>>, vector<16x32xf32>
    %c0_1 = arith.constant 0 : index
    %c0_2 = arith.constant 0 : index
    %1 = vector.load %arg2[%c0_1, %c0_2] : memref<32x128xf32, #tpu.memory_space<vmem>>, vector<32x128xf32>
    %cst = arith.constant dense<0.000000e+00> : vector<16x128xf32>
    %2 = tpu.matmul %0, %1, %cst {dimension_numbers = #tpu.dot_dimension_numbers<[1], [0], [0], [1], [0, 0, 1, 1], [], []>} : vector<16x32xf32>, vector<32x128xf32>, vector<16x128xf32> -> vector<16x128xf32>
    %c0_3 = arith.constant 0 : index
    %c0_4 = arith.constant 0 : index
    %3 = vector.load %arg3[%c0_3, %c0_4] : memref<1x128xf32, #tpu.memory_space<vmem>>, vector<1x128xf32>
    %4 = vector.broadcast %3 : vector<1x128xf32> to vector<16x128xf32>
    %5 = arith.addf %2, %4 : vector<16x128xf32>
    %6 = arith.mulf %5, %5 : vector<16x128xf32>
    %7 = arith.mulf %6, %5 : vector<16x128xf32>
    %cst_5 = arith.constant 4.471500e-02 : f32
    %8 = vector.broadcast %cst_5 : f32 to vector<16x128xf32>
    %9 = arith.mulf %8, %7 : vector<16x128xf32>
    %10 = arith.addf %5, %9 : vector<16x128xf32>
    %cst_6 = arith.constant 1.59576917 : f32
    %11 = vector.broadcast %cst_6 : f32 to vector<16x128xf32>
    %12 = arith.mulf %11, %10 : vector<16x128xf32>
    %cst_7 = arith.constant 0.000000e+00 : f32
    %13 = vector.broadcast %cst_7 : f32 to vector<16x128xf32>
    %14 = arith.subf %13, %12 : vector<16x128xf32>
    %15 = math.exp %14 : vector<16x128xf32>
    %cst_8 = arith.constant 1.000000e+00 : f32
    %16 = vector.broadcast %cst_8 : f32 to vector<16x128xf32>
    %17 = arith.addf %16, %15 : vector<16x128xf32>
    %18 = arith.divf %5, %17 : vector<16x128xf32>
    %c0_9 = arith.constant 0 : index
    %c0_10 = arith.constant 0 : index
    %19 = vector.load %arg4[%c0_9, %c0_10] : memref<128x128xf32, #tpu.memory_space<vmem>>, vector<128x128xf32>
    %cst_11 = arith.constant dense<0.000000e+00> : vector<16x128xf32>
    %20 = tpu.matmul %18, %19, %cst_11 {dimension_numbers = #tpu.dot_dimension_numbers<[1], [0], [0], [1], [0, 0, 1, 1], [], []>} : vector<16x128xf32>, vector<128x128xf32>, vector<16x128xf32> -> vector<16x128xf32>
    %c0_12 = arith.constant 0 : index
    %c0_13 = arith.constant 0 : index
    %21 = vector.load %arg5[%c0_12, %c0_13] : memref<1x128xf32, #tpu.memory_space<vmem>>, vector<1x128xf32>
    %22 = vector.broadcast %21 : vector<1x128xf32> to vector<16x128xf32>
    %23 = arith.addf %20, %22 : vector<16x128xf32>
    %c0_14 = arith.constant 0 : index
    %c0_15 = arith.constant 0 : index
    %24 = vector.load %arg6[%c0_14, %c0_15] : memref<16x128xf32, #tpu.memory_space<vmem>>, vector<16x128xf32>
    tpu.vector_store %arg6[%c0_14, %c0_15], %23 {strides = array<i32>} : memref<16x128xf32, #tpu.memory_space<vmem>>, vector<16x128xf32>,
    return
  }
  func.func @transform_0(%arg0: i32) -> (i32, i32) {
    %c0_i32 = arith.constant 0 : i32
    %c0_i32_0 = arith.constant 0 : i32
    return %arg0, %c0_i32 : i32, i32
  }
  func.func @transform_1(%arg0: i32) -> (i32, i32) {
    %c0_i32 = arith.constant 0 : i32
    %c0_i32_0 = arith.constant 0 : i32
    %c0_i32_1 = arith.constant 0 : i32
    return %c0_i32, %c0_i32_0 : i32, i32
  }
  func.func @transform_2(%arg0: i32) -> (i32, i32) {
    %c0_i32 = arith.constant 0 : i32
    %c0_i32_0 = arith.constant 0 : i32
    %c0_i32_1 = arith.constant 0 : i32
    return %c0_i32, %c0_i32_0 : i32, i32
  }
  func.func @transform_3(%arg0: i32) -> (i32, i32) {
    %c0_i32 = arith.constant 0 : i32
    %c0_i32_0 = arith.constant 0 : i32
    %c0_i32_1 = arith.constant 0 : i32
    return %c0_i32, %c0_i32_0 : i32, i32
  }
  func.func @transform_4(%arg0: i32) -> (i32, i32) {
    %c0_i32 = arith.constant 0 : i32
    %c0_i32_0 = arith.constant 0 : i32
    %c0_i32_1 = arith.constant 0 : i32
    return %c0_i32, %c0_i32_0 : i32, i32
  }
  func.func @transform_5(%arg0: i32) -> (i32, i32) {
    %c0_i32 = arith.constant 0 : i32
    %c0_i32_0 = arith.constant 0 : i32
    return %arg0, %c0_i32 : i32, i32
  }
}

</mosaic_0001>

<bundles_post_ra>
// kernel: _mlp_pallas_call.1
= control target key start
LH: loop header
LB: loop body
LE: loop exit
PB: predicated region body
PF: predicated region fallthrough
CT: control target
= control target key end

     0   :  { %s337_s0 = inlined_call_operand.vmem [shape: f32[16,32], index: 0, kind: input, shape index: {}]   ;;  %s338_s1 = inlined_call_operand.vmem [shape: f32[32,128], index: 1, kind: input, shape index: {}]   ;;  %s339_s2 = inlined_call_operand.vmem [shape: f32[1,128], index: 2, kind: input, shape index: {}]   ;;  %s340_s3 = inlined_call_operand.vmem [shape: f32[128,128], index: 3, kind: input, shape index: {}]   ;;  %s341_s4 = inlined_call_operand.vmem [shape: f32[1,128], index: 4, kind: input, shape index: {}]   ;;  %s342_s5 = inlined_call_operand.hbm [shape: f32[16,128], index: 5, kind: output, shape index: {}]  }
   0x1   :  { %v26_v0 = vld [vmem:[%s338_s1 + $0x18] sm:$0xff]  ;;  %v25_v1 = vld [vmem:[%s338_s1 + $0x10] sm:$0xff]  ;;  %v24_v2 = vld [vmem:[%s338_s1 + $0x8] sm:$0xff] }
   0x2   :  { %50 = vmatpush.msra.mxu0 %v26_v0 }
   0x4   :  { %51 = vmatpush.msra.mxu0 %v25_v1 }
   0x5   :  { %10 = vsyncpa [#allocation3], 0  ;;  %v23_v3 = vld [vmem:[%s338_s1] sm:$0xff]  ;;  %vm31_vm0 = vcmask 261120   ;;  %v22_v5 = vld [vmem:[%s337_s0 + $0x8] sm:$0xff]  ;;  %s229_s10 = smov [#allocation2]  }
   0x6   :  { %52 = vmatpush.msra.mxu0 %v24_v2  ;;  %v21_v4 = vld [vmem:[%s337_s0] sm:$0xff]  ;;  %v124_v6 = vld [vmem:[%s340_s3 + $0x78] sm:$0xff]  ;;  %v123_v7 = vld [vmem:[%s340_s3 + $0x70] sm:$0xff]  ;;  %s158_s11 = sshll.u32 %s229_s10, 4  ;;  %s160_s14 = sshll.u32 %s342_s5, 4  ;;  %s159_s11 = int_to_ptr.vmem [resolvable:$true] %s158_s11  ;;  %s161_s14 = int_to_ptr.hbm [resolvable:$true] %s160_s14 }
   0x7   :  { %129 = vmatpush.msra.mxu1 %v124_v6  ;;  %174 = vmatpush.msra.mxu2 %v124_v6  ;;  %v122_v8 = vld [vmem:[%s340_s3 + $0x68] sm:$0xff]  ;;  %v121_v9 = vld [vmem:[%s340_s3 + $0x60] sm:$0xff]  ;;  %v120_v10 = vld [vmem:[%s340_s3 + $0x58] sm:$0xff]  ;;  %s230_s15 = smov 128   ;;  %s231_s16 = smov 8  }
   0x8   :  { %53 = vmatpush.msra.mxu0 %v23_v3  ;;  %v119_v11 = vld [vmem:[%s340_s3 + $0x50] sm:$0xff]  ;;  %v118_v12 = vld [vmem:[%s340_s3 + $0x48] sm:$0xff]  ;;  %v117_v13 = vld [vmem:[%s340_s3 + $0x40] sm:$0xff] }
   0x9   :  { %172 = vmatmul.msk.f32.vlgmr.msra.gmra.mxu0 %vm31_vm0, %v21_v4  ;;  %130 = vmatpush.msra.mxu1 %v123_v7  ;;  %v193_v14 = vld [vmem:[%s339_s2] ss:$0 sm:$0xff]  ;;  %v116_v15 = vld [vmem:[%s340_s3 + $0x38] sm:$0xff]  ;;  %v115_v16 = vld [vmem:[%s340_s3 + $0x30] sm:$0xff] }
   0xa   :  { %175 = vmatpush.msra.mxu2 %v123_v7  ;;  %v114_v19 = vld [vmem:[%s340_s3 + $0x28] sm:$0xff]  ;;  %v113_v20 = vld [vmem:[%s340_s3 + $0x20] sm:$0xff]  ;;  %v112_v22 = vld [vmem:[%s340_s3 + $0x18] sm:$0xff] }
   0xb   :  { %131 = vmatpush.msra.mxu1 %v122_v8  ;;  %v111_v24 = vld [vmem:[%s340_s3 + $0x10] sm:$0xff]  ;;  %v110_v26 = vld [vmem:[%s340_s3 + $0x8] sm:$0xff]  ;;  %v109_v30 = vld [vmem:[%s340_s3] sm:$0xff] }
   0xc   :  { %176 = vmatpush.msra.mxu2 %v122_v8  ;;  %v194_v3 = vld [vmem:[%s341_s4] ss:$0 sm:$0xff] }
   0xd   :  { %132 = vmatpush.msra.mxu1 %v121_v9 }
   0xe   :  { %177 = vmatpush.msra.mxu2 %v121_v9 }
   0xf   :  { %133 = vmatpush.msra.mxu1 %v120_v10 }
  0x10   :  { %178 = vmatpush.msra.mxu2 %v120_v10 }
  0x11   :  { %173 = vmatmul.msk.f32.gmra.mxu0 %vm31_vm0, %v22_v5  ;;  %134 = vmatpush.msra.mxu1 %v119_v11 }
  0x12   :  { %179 = vmatpush.msra.mxu2 %v119_v11 }
  0x13   :  { %135 = vmatpush.msra.mxu1 %v118_v12 }
  0x14   :  { %180 = vmatpush.msra.mxu2 %v118_v12 }
  0x15   :  { %136 = vmatpush.msra.mxu1 %v117_v13 }
  0x16   :  { %181 = vmatpush.msra.mxu2 %v117_v13 }
  0x17   :  { %137 = vmatpush.msra.mxu1 %v116_v15 }
  0x18   :  { %182 = vmatpush.msra.mxu2 %v116_v15 }
  0x19   :  { %138 = vmatpush.msra.mxu1 %v115_v16 }
  0x1a   :  { %183 = vmatpush.msra.mxu2 %v115_v16 }
  0x1b   :  { %139 = vmatpush.msra.mxu1 %v114_v19 }
  0x1c   :  { %184 = vmatpush.msra.mxu2 %v114_v19 }
  0x1d   :  { %140 = vmatpush.msra.mxu1 %v113_v20 }
  0x1e   :  { %185 = vmatpush.msra.mxu2 %v113_v20 }
  0x1f   :  { %141 = vmatpush.msra.mxu1 %v112_v22 }
  0x20   :  { %186 = vmatpush.msra.mxu2 %v112_v22 }
  0x21   :  { %142 = vmatpush.msra.mxu1 %v111_v24 }
  0x22   :  { %187 = vmatpush.msra.mxu2 %v111_v24 }
  0x23   :  { %143 = vmatpush.msra.mxu1 %v110_v26 }
  0x24   :  { %188 = vmatpush.msra.mxu2 %v110_v26 }
  0x25   :  { %144 = vmatpush.msra.mxu1 %v109_v30 }
  0x26   :  { %189 = vmatpush.msra.mxu2 %v109_v30 }
  0x86   :  { %v55_v17 = vpop.f32.mrf.mxu0 }
  0x87   :  { %v56_v18 = vadd.f32 %v193_v14, %v55_v17 }
  0x89   :  { %v61_v21 = vmul.f32 %v56_v18, %v56_v18 }
  0x8b   :  { %v63_v23 = vmul.f32 %v61_v21, %v56_v18 }
  0x8d   :  { %v65_v25 = vmul.f32 0.044715, %v63_v23 }
  0x8e   :  { %v58_v27 = vpop.f32.mrf.mxu0 }
  0x8f   :  { %v67_v28 = vadd.f32 %v65_v25, %v56_v18  ;;  %v59_v29 = vadd.f32 %v193_v14, %v58_v27 }
  0x91   :  { %v69_v31 = vmul.f32 1.5957692, %v67_v28  ;;  %v62_v32 = vmul.f32 %v59_v29, %v59_v29 }
  0x93   :  { %v71_v33 = vsub.f32 0.0, %v69_v31  ;;  %v64_v34 = vmul.f32 %v62_v32, %v59_v29 }
  0x95   :  { %v73_v35 = vmul.f32 1.442695, %v71_v33  ;;  %v66_v36 = vmul.f32 0.044715, %v64_v34 }
  0x97   :  { %195 = vpow2.f32 %v73_v35  ;;  %v68_v37 = vadd.f32 %v66_v36, %v59_v29 }
  0x99   :  { %v70_v38 = vmul.f32 1.5957692, %v68_v37 }
  0x9b   :  { %v72_v39 = vsub.f32 0.0, %v70_v38 }
  0x9d   :  { %v196_v40 = vpop.eup %195  ;;  %v75_v41 = vmul.f32 1.442695, %v72_v39 }
  0x9e   :  { %v77_v42 = vadd.f32 1.0, %v196_v40 }
  0x9f   :  { %197 = vpow2.f32 %v75_v41 }
  0xa0   :  { %199 = vrcp.f32 %v77_v42  ;;  %v90_v48 = vand.u32 2147483648, %v77_v42  ;;  %v88_v50 = vand.u32 2147483647, %v77_v42  ;;  %vm84_vm2 = vweird.f32 %v77_v42 }
  0xa2   :  { %v91_v53 = vor.u32 1.1754944e-38, %v90_v48  ;;  %vm89_vm4 = vcmp.eq.f32.partialorder %v88_v50, 8.507059e+37 }
  0xa5   :  { %v198_v43 = vpop.eup %197 }
  0xa6   :  { %v200_v44 = vpop.eup %199  ;;  %v78_v45 = vadd.f32 1.0, %v198_v43 }
  0xa7   :  { %v80_v46 = vmul.f32 %v200_v44, %v77_v42  ;;  %vm85_vm1 = vweird.f32 %v200_v44 }
  0xa8   :  { %201 = vrcp.f32 %v78_v45  ;;  %vm86_vm3 = vmor %vm84_vm2, %vm85_vm1  ;;  %v105_v59 = vand.u32 2147483648, %v78_v45  ;;  %v103_v61 = vand.u32 2147483647, %v78_v45  ;;  %vm99_vm6 = vweird.f32 %v78_v45 }
  0xa9   :  { %v81_v47 = vsub.f32 1.0, %v80_v46 }
  0xaa   :  { %v106_v63 = vor.u32 1.1754944e-38, %v105_v59  ;;  %vm104_vm8 = vcmp.eq.f32.partialorder %v103_v61, 8.507059e+37 }
  0xab   :  { %v82_v49 = vmul.f32 %v200_v44, %v81_v47 }
  0xad   :  { %v83_v51 = vadd.f32 %v200_v44, %v82_v49 }
  0xae   :  { %v202_v52 = vpop.eup %201 }
  0xaf   :  { %v87_v54 = vsel %vm86_vm3, %v200_v44, %v83_v51  ;;  %v95_v55 = vmul.f32 %v202_v52, %v78_v45  ;;  %vm100_vm5 = vweird.f32 %v202_v52 }
  0xb0   :  { %v92_v56 = vsel %vm89_vm4, %v91_v53, %v87_v54  ;;  %vm101_vm7 = vmor %vm99_vm6, %vm100_vm5 }
  0xb1   :  { %v93_v57 = vmul.f32 %v92_v56, %v56_v18  ;;  %v96_v58 = vsub.f32 1.0, %v95_v55 }
  0xb3   :  { %145 = vmatmul.f32.vlgmr.msra.gmra.mxu1 %v93_v57  ;;  %v97_v60 = vmul.f32 %v202_v52, %v96_v58 }
  0xb5   :  { %v98_v62 = vadd.f32 %v202_v52, %v97_v60 }
  0xb7   :  { %v102_v0 = vsel %vm101_vm7, %v202_v52, %v98_v62 }
  0xb8   :  { %v107_v1 = vsel %vm104_vm8, %v106_v63, %v102_v0 }
  0xb9   :  { %v108_v2 = vmul.f32 %v107_v1, %v59_v29 }
  0xbb   :  { %148 = vmatmul.f32.vlgmr.msra.gmra.mxu2 %v108_v2 }
 0x130   :  { %v146_v4 = vpop.f32.mrf.mxu1 }
 0x131   :  { %v147_v5 = vadd.f32 %v194_v3, %v146_v4 }
 0x133   :  { %152 = vst [vmem:[#allocation2] sm:$0xff] %v147_v5 }
 0x13e   :  { %v149_v6 = vpop.f32.mrf.mxu2 }
 0x13f   :  { %v150_v7 = vadd.f32 %v194_v3, %v149_v6 }
 0x141   :  { %153 = vst [vmem:[#allocation2 + $0x8] sm:$0xff] %v150_v7 }
 0x142   :  { %166 = dma.vmem_to_hbm [thread:$0]  %s159_s11, 256, %s161_s14, [#allocation3], %s230_s15, %s230_s15, %s231_s16  }
 0x143   :  { %227 = dma.done.wait [#allocation3], 256  }
 0x144   :  { %228 = vsyncadd [#allocation3], 4294967040 }
 0x145   :  { %171 = vsyncpa [#allocation3], 1 }

</bundles_post_ra>
